<compile_context>
chip_gen: v7x
topology: tpu7x:2x2x1
jax: 0.10.0
libtpu: 0.0.40
codegen_flags: <defaults>
</compile_context>

<pallas_src>
import functools

import jax
import jax.numpy as jnp
from jax import lax
from jax.experimental import pallas as pl
from jax.experimental.pallas import tpu as pltpu


def _round_up(x, m):
    return ((x + m - 1) // m) * m


# --------------------------------------------------------------------------
# Kernel
# --------------------------------------------------------------------------
def _multimodal_kernel(
    eeg_ref,      # (TB, TK)           f32  (native activation, unpadded array)
    w_eeg_ref,    # (TK, 64) or (Kp,64) bf16 (zero-padded rows)
    meta_ref,     # (TB, meta_dim)     f32
    w_m1_ref,     # (meta_dim, 32)     f32
    w_m2_ref,     # (32, 16)           f32
    c_ref,        # (8, 128)           f32  packed small params
    out_ref,      # (1, 1, TB)         f32  lane-dense result
    acc_ref,      # (TB, 64)           f32  VMEM scratch (eeg accumulator)
    r2_ref,       # (1, TB)            f32  VMEM scratch (meta contribution)
    *, tk, k_valid, w_resident,
):
    k = pl.program_id(1)
    nk = pl.num_programs(1)
    consts = c_ref[...]                                   # (8, 128)

    # ---- per-batch-tile init + meta branch (off the epilogue path) --------
    @pl.when(k == 0)
    def _():
        acc_ref[...] = jnp.zeros_like(acc_ref)
        b_m1 = consts[1:2, 0:32]
        b_m2 = consts[2:3, 0:16]
        v2 = consts[4:5, 0:16]                            # (1, 16) = (w_d2 @ w_c).T
        h = jnp.dot(meta_ref[...], w_m1_ref[...],
                    preferred_element_type=jnp.float32)
        h = jnp.maximum(h + b_m1, 0.0)                    # (TB, 32)
        x2 = jnp.dot(h, w_m2_ref[...],
                     preferred_element_type=jnp.float32)
        x2 = jnp.maximum(x2 + b_m2, 0.0)                  # (TB, 16)
        # folded classifier contribution of the meta branch, lane-dense (1, TB)
        r2_ref[...] = lax.dot_general(
            v2, x2, (((1,), (1,)), ((), ())),
            preferred_element_type=jnp.float32)

    # ---- eeg_model matmul, streamed over K ---------------------------------
    e = eeg_ref[...]                                      # f32 straight from HBM
    if k_valid % tk != 0:                                 # static: ragged K tail only
        col = lax.broadcasted_iota(jnp.int32, e.shape, 1) + k * tk
        e = jnp.where(col < k_valid, e, 0.0)
    e = e.astype(jnp.bfloat16)                            # cast right before the MXU
    if w_resident:
        off = pl.multiple_of(k * tk, tk)
        w = w_eeg_ref[pl.ds(off, tk), :]                  # slice resident weights
    else:
        w = w_eeg_ref[...]
    acc_ref[...] += jnp.dot(e, w, preferred_element_type=jnp.float32)

    # ---- finalize on the last K step ---------------------------------------
    @pl.when(k == nk - 1)
    def _():
        b_eeg = consts[0:1, 0:64]
        v1 = consts[3:4, 0:64]                            # (1, 64) = (w_d1 @ w_c).T
        b_f = consts[5:6, 0:1]                            # (1, 1)  = b_d @ w_c + b_c
        x1 = jnp.maximum(acc_ref[...] + b_eeg, 0.0)       # (TB, 64)
        r1 = lax.dot_general(                             # lane-dense (1, TB)
            v1, x1, (((1,), (1,)), ((), ())),
            preferred_element_type=jnp.float32)
        out_ref[...] = jnp.reshape(r1 + r2_ref[...] + b_f, out_ref.shape)


# --------------------------------------------------------------------------
# One-time parameter preparation (hoisted out of the per-call path)
# --------------------------------------------------------------------------
def prepare_params(params, *, block_k=4096):
    """Pad+cast w_eeg, fold dense+classifier, pack tiny params into one slab."""
    K = params["w_eeg"].shape[0]
    tk = min(int(block_k), _round_up(K, 128))
    k_pad = _round_up(K, tk)

    w_eeg_p = (jnp.zeros((k_pad, 64), jnp.float32)
               .at[:K, :].set(params["w_eeg"].astype(jnp.float32))
               ).astype(jnp.bfloat16)

    # Fold dense -> classifier (valid: no nonlinearity between them).
    v1 = (params["w_d1"] @ params["w_c"]).reshape(-1)                  # (64,)
    v2 = (params["w_d2"] @ params["w_c"]).reshape(-1)                  # (16,)
    b_f = (params["b_d"] @ params["w_c"] + params["b_c"]).reshape(-1)  # (1,)

    c = jnp.zeros((8, 128), jnp.float32)
    c = c.at[0, :64].set(params["b_eeg"].reshape(-1))
    c = c.at[1, :32].set(params["b_m1"].reshape(-1))
    c = c.at[2, :16].set(params["b_m2"].reshape(-1))
    c = c.at[3, :64].set(v1)
    c = c.at[4, :16].set(v2)
    c = c.at[5, 0].set(b_f[0])

    return {
        "w_eeg": w_eeg_p,                                   # (k_pad, 64) bf16
        "w_m1": params["w_m1"].astype(jnp.float32),
        "w_m2": params["w_m2"].astype(jnp.float32),
        "consts": c,
        "k_valid": K,
        "tk": tk,
        "k_pad": k_pad,
    }


# --------------------------------------------------------------------------
# Forward wrapper
# --------------------------------------------------------------------------
def multimodal_forward(eeg_data, meta_data, prepared, *, block_b=256):
    """eeg_data: (B, C, T) float32, meta_data: (B, meta_dim) float32."""
    B = eeg_data.shape[0]
    eeg_flat = eeg_data.reshape(B, -1).astype(jnp.float32)   # no pad / no copy
    K = prepared["k_valid"]
    assert eeg_flat.shape[1] == K, "eeg flat dim mismatch with prepared params"
    tk = prepared["tk"]
    k_pad = prepared["k_pad"]
    meta = meta_data.astype(jnp.float32)
    meta_dim = meta.shape[1]

    # Batch tiling: sublane multiple of 8; keep >= 2 tiles when B allows (v7x).
    TB = min(int(block_b), _round_up(B, 8))
    nb = pl.cdiv(B, TB)
    if nb == 1 and B > 8:
        TB = _round_up(pl.cdiv(B, 2), 8)
        nb = pl.cdiv(B, TB)
    nk = k_pad // tk

    # Keep w_eeg fully VMEM-resident when small (<= 2 MiB); otherwise stream.
    w_resident = (k_pad * 64 * 2) <= (2 << 20)
    if w_resident:
        w_spec = pl.BlockSpec((k_pad, 64), lambda b, k: (0, 0))
    else:
        w_spec = pl.BlockSpec((tk, 64), lambda b, k: (k, 0))

    kernel = functools.partial(
        _multimodal_kernel, tk=tk, k_valid=K, w_resident=w_resident)

    out = pl.pallas_call(
        kernel,
        out_shape=jax.ShapeDtypeStruct((nb, 1, TB), jnp.float32),
        grid_spec=pltpu.PrefetchScalarGridSpec(
            num_scalar_prefetch=0,
            grid=(nb, nk),                                  # (batch tiles, eeg-K tiles)
            in_specs=[
                pl.BlockSpec((TB, tk), lambda b, k: (b, k)),        # eeg (f32)
                w_spec,                                             # w_eeg (bf16)
                pl.BlockSpec((TB, meta_dim), lambda b, k: (b, 0)),  # meta
                pl.BlockSpec((meta_dim, 32), lambda b, k: (0, 0)),  # w_m1
                pl.BlockSpec((32, 16), lambda b, k: (0, 0)),        # w_m2
                pl.BlockSpec((8, 128), lambda b, k: (0, 0)),        # consts slab
            ],
            out_specs=pl.BlockSpec((1, 1, TB), lambda b, k: (b, 0, 0)),
            scratch_shapes=[pltpu.VMEM((TB, 64), jnp.float32),
                            pltpu.VMEM((1, TB), jnp.float32)],
        ),
        compiler_params=pltpu.CompilerParams(
            # batch tiles shard across TensorCores; K is the reduction axis.
            dimension_semantics=("parallel", "arbitrary"),
            vmem_limit_bytes=64 << 20),
    )(eeg_flat, prepared["w_eeg"], meta,
      prepared["w_m1"], prepared["w_m2"], prepared["consts"])

    # Lane-dense (nb, 1, TB) -> (B, 1); batch-tail garbage positions discarded.
    return out.reshape(nb * TB)[:B].reshape(B, 1)


# --------------------------------------------------------------------------
# Params + pure-JAX reference (mirrors the PyTorch forward, eval mode)
# --------------------------------------------------------------------------
def init_params(key, eeg_flat_dim, meta_input_dim):
    ks = jax.random.split(key, 12)

    def lin(kw, kb, fan_in, fan_out):
        bound = 1.0 / jnp.sqrt(fan_in)
        w = jax.random.uniform(kw, (fan_in, fan_out), jnp.float32, -bound, bound)
        b = jax.random.uniform(kb, (1, fan_out), jnp.float32, -bound, bound)
        return w, b

    w_eeg, b_eeg = lin(ks[0], ks[1], eeg_flat_dim, 64)
    w_m1, b_m1 = lin(ks[2], ks[3], meta_input_dim, 32)
    w_m2, b_m2 = lin(ks[4], ks[5], 32, 16)
    w_d, b_d = lin(ks[6], ks[7], 64 + 16, 16)   # dense over cat([x1(64), x2(16)])
    w_c, b_c = lin(ks[8], ks[9], 16, 1)

    return {
        "w_eeg": w_eeg, "b_eeg": b_eeg,
        "w_m1": w_m1, "b_m1": b_m1,
        "w_m2": w_m2, "b_m2": b_m2,
        "w_d1": w_d[:64, :], "w_d2": w_d[64:, :], "b_d": b_d,
        "w_c": w_c, "b_c": b_c,
    }


def reference_forward(eeg_data, meta_data, params):
    """Mirror of the PyTorch forward; eeg matmul in bf16 to match the kernel."""
    B = eeg_data.shape[0]
    eeg_flat = eeg_data.reshape(B, -1)
    x1 = jnp.dot(eeg_flat.astype(jnp.bfloat16),
                 params["w_eeg"].astype(jnp.bfloat16),
                 preferred_element_type=jnp.float32)
    x1 = jnp.maximum(x1 + params["b_eeg"], 0.0)
    h = jnp.maximum(meta_data @ params["w_m1"] + params["b_m1"], 0.0)
    x2 = jnp.maximum(h @ params["w_m2"] + params["b_m2"], 0.0)
    x = jnp.concatenate([x1, x2], axis=1)
    w_d = jnp.concatenate([params["w_d1"], params["w_d2"]], axis=0)
    d = x @ w_d + params["b_d"]
    return d @ params["w_c"] + params["b_c"]


if __name__ == "__main__":
    key = jax.random.PRNGKey(0)
    k_eeg, k_meta, k_params = jax.random.split(key, 3)

    B, C, T = 8, 4, 32          # eeg_data (B, C, T) -> flattened dim 128
    META_DIM = 16               # meta_input_dim

    eeg_data = jax.random.normal(k_eeg, (B, C, T), jnp.float32)
    meta_data = jax.random.normal(k_meta, (B, META_DIM), jnp.float32)
    params = init_params(k_params, C * T, META_DIM)
    prepared = prepare_params(params)          # one-time param prep

    out = jax.block_until_ready(multimodal_forward(eeg_data, meta_data, prepared))
    ref = reference_forward(eeg_data, meta_data, params)

    assert out.shape == (B, 1)
    assert jnp.allclose(out, ref, atol=1e-3, rtol=1e-3)

    # TODO(synk): Dropout(p=0.25) is identity here (inference mode); training-mode
    # stochastic masking would need pltpu.prng_seed / prng_random_bits.
    # TODO(synk): the eeg_model submodule is an __init__ argument of the PyTorch
    # module; it is realized here as Linear(eeg_flat_dim -> 64) + ReLU.
    print("KERNEL_OK")
</pallas_src>

<mosaic_0001>
module attributes {stable_mosaic.version = 11 : i64} {
  func.func @_multimodal_kernel(%arg0: i32, %arg1: i32, %arg2: memref<8x128xf32, #tpu.memory_space<vmem>>, %arg3: memref<128x64xbf16, #tpu.memory_space<vmem>>, %arg4: memref<8x16xf32, #tpu.memory_space<vmem>>, %arg5: memref<16x32xf32, #tpu.memory_space<vmem>>, %arg6: memref<32x16xf32, #tpu.memory_space<vmem>>, %arg7: memref<8x128xf32, #tpu.memory_space<vmem>>, %arg8: memref<1x1x8xf32, #tpu.memory_space<vmem>>, %arg9: memref<8x64xf32, #tpu.memory_space<vmem>>, %arg10: memref<1x8xf32, #tpu.memory_space<vmem>>) attributes {dimension_semantics = [#tpu.dimension_semantics<parallel>, #tpu.dimension_semantics<arbitrary>], iteration_bounds = array<i64: 1, 1>, scalar_prefetch = 0 : i64, scratch_operands = 2 : i64, tpu.core_type = #tpu.core_type<tc>, window_params = [{transform_indices = @transform_0, window_bounds = array<i64: 8, 128>}, {pipeline_mode = #tpu.pipeline_mode<synchronous>, transform_indices = @transform_1, window_bounds = array<i64: 128, 64>}, {transform_indices = @transform_2, window_bounds = array<i64: 8, 16>}, {pipeline_mode = #tpu.pipeline_mode<synchronous>, transform_indices = @transform_3, window_bounds = array<i64: 16, 32>}, {pipeline_mode = #tpu.pipeline_mode<synchronous>, transform_indices = @transform_4, window_bounds = array<i64: 32, 16>}, {pipeline_mode = #tpu.pipeline_mode<synchronous>, transform_indices = @transform_5, window_bounds = array<i64: 8, 128>}, {transform_indices = @transform_6, window_bounds = array<i64: 1, 1, 8>}]} {
    %c0 = arith.constant 0 : index
    %c0_0 = arith.constant 0 : index
    %0 = vector.load %arg7[%c0, %c0_0] : memref<8x128xf32, #tpu.memory_space<vmem>>, vector<8x128xf32>
    %c0_i32 = arith.constant 0 : i32
    %1 = arith.cmpi eq, %arg1, %c0_i32 : i32
    %2 = arith.extui %1 : i1 to i32
    %c0_i32_1 = arith.constant 0 : i32
    %3 = arith.cmpi ne, %2, %c0_i32_1 : i32
    scf.if %3 {
      %cst_11 = arith.constant 0.000000e+00 : f32
      %17 = vector.broadcast %cst_11 : f32 to vector<8x64xf32>
      %c0_12 = arith.constant 0 : index
      %c0_13 = arith.constant 0 : index
      %18 = vector.load %arg9[%c0_12, %c0_13] : memref<8x64xf32, #tpu.memory_space<vmem>>, vector<8x64xf32>
      tpu.vector_store %arg9[%c0_12, %c0_13], %17 {strides = array<i32>} : memref<8x64xf32, #tpu.memory_space<vmem>>, vector<8x64xf32>,
      %19 = vector.extract_strided_slice %0 {offsets = [1, 0], sizes = [1, 32], strides = [1, 1]} : vector<8x128xf32> to vector<1x32xf32>
      %20 = vector.extract_strided_slice %0 {offsets = [2, 0], sizes = [1, 16], strides = [1, 1]} : vector<8x128xf32> to vector<1x16xf32>
      %21 = vector.extract_strided_slice %0 {offsets = [4, 0], sizes = [1, 16], strides = [1, 1]} : vector<8x128xf32> to vector<1x16xf32>
      %c0_14 = arith.constant 0 : index
      %c0_15 = arith.constant 0 : index
      %22 = vector.load %arg4[%c0_14, %c0_15] : memref<8x16xf32, #tpu.memory_space<vmem>>, vector<8x16xf32>
      %c0_16 = arith.constant 0 : index
      %c0_17 = arith.constant 0 : index
      %23 = vector.load %arg5[%c0_16, %c0_17] : memref<16x32xf32, #tpu.memory_space<vmem>>, vector<16x32xf32>
      %cst_18 = arith.constant dense<0.000000e+00> : vector<8x32xf32>
      %24 = tpu.matmul %22, %23, %cst_18 {dimension_numbers = #tpu.dot_dimension_numbers<[1], [0], [0], [1], [0, 0, 1, 1], [], []>} : vector<8x16xf32>, vector<16x32xf32>, vector<8x32xf32> -> vector<8x32xf32>
      %25 = vector.broadcast %19 : vector<1x32xf32> to vector<8x32xf32>
      %26 = arith.addf %24, %25 : vector<8x32xf32>
      %cst_19 = arith.constant 0.000000e+00 : f32
      %27 = vector.broadcast %cst_19 : f32 to vector<8x32xf32>
      %28 = arith.maximumf %26, %27 : vector<8x32xf32>
      %c0_20 = arith.constant 0 : index
      %c0_21 = arith.constant 0 : index
      %29 = vector.load %arg6[%c0_20, %c0_21] : memref<32x16xf32, #tpu.memory_space<vmem>>, vector<32x16xf32>
      %cst_22 = arith.constant dense<0.000000e+00> : vector<8x16xf32>
      %30 = tpu.matmul %28, %29, %cst_22 {dimension_numbers = #tpu.dot_dimension_numbers<[1], [0], [0], [1], [0, 0, 1, 1], [], []>} : vector<8x32xf32>, vector<32x16xf32>, vector<8x16xf32> -> vector<8x16xf32>
      %31 = vector.broadcast %20 : vector<1x16xf32> to vector<8x16xf32>
      %32 = arith.addf %30, %31 : vector<8x16xf32>
      %cst_23 = arith.constant 0.000000e+00 : f32
      %33 = vector.broadcast %cst_23 : f32 to vector<8x16xf32>
      %34 = arith.maximumf %32, %33 : vector<8x16xf32>
      %cst_24 = arith.constant dense<0.000000e+00> : vector<1x8xf32>
      %35 = tpu.matmul %21, %34, %cst_24 {dimension_numbers = #tpu.dot_dimension_numbers<[1], [1], [0], [0], [0, 0, 1, 0], [], []>} : vector<1x16xf32>, vector<8x16xf32>, vector<1x8xf32> -> vector<1x8xf32>
      %c0_25 = arith.constant 0 : index
      %c0_26 = arith.constant 0 : index
      %36 = vector.load %arg10[%c0_25, %c0_26] : memref<1x8xf32, #tpu.memory_space<vmem>>, vector<1x8xf32>
      tpu.vector_store %arg10[%c0_25, %c0_26], %35 {strides = array<i32>} : memref<1x8xf32, #tpu.memory_space<vmem>>, vector<1x8xf32>,
    } else {
    }
    %c0_2 = arith.constant 0 : index
    %c0_3 = arith.constant 0 : index
    %4 = vector.load %arg2[%c0_2, %c0_3] : memref<8x128xf32, #tpu.memory_space<vmem>>, vector<8x128xf32>
    %5 = arith.truncf %4 : vector<8x128xf32> to vector<8x128xbf16>
    %c128_i32 = arith.constant 128 : i32
    %6 = arith.muli %arg1, %c128_i32 : i32
    %7 = tpu.assume_multiple %6, 128 : i32
    %8 = arith.index_cast %7 : i32 to index
    %c0_4 = arith.constant 0 : index
    %9 = vector.load %arg3[%8, %c0_4] : memref<128x64xbf16, #tpu.memory_space<vmem>>, vector<128x64xbf16>
    %c0_5 = arith.constant 0 : index
    %c0_6 = arith.constant 0 : index
    %10 = vector.load %arg9[%c0_5, %c0_6] : memref<8x64xf32, #tpu.memory_space<vmem>>, vector<8x64xf32>
    %cst = arith.constant dense<0.000000e+00> : vector<8x64xf32>
    %11 = tpu.matmul %5, %9, %cst {dimension_numbers = #tpu.dot_dimension_numbers<[1], [0], [0], [1], [0, 0, 1, 1], [], []>} : vector<8x128xbf16>, vector<128x64xbf16>, vector<8x64xf32> -> vector<8x64xf32>
    %12 = arith.addf %10, %11 : vector<8x64xf32>
    %c0_7 = arith.constant 0 : index
    %c0_8 = arith.constant 0 : index
    %13 = vector.load %arg9[%c0_7, %c0_8] : memref<8x64xf32, #tpu.memory_space<vmem>>, vector<8x64xf32>
    tpu.vector_store %arg9[%c0_7, %c0_8], %12 {strides = array<i32>} : memref<8x64xf32, #tpu.memory_space<vmem>>, vector<8x64xf32>,
    %c0_i32_9 = arith.constant 0 : i32
    %14 = arith.cmpi eq, %arg1, %c0_i32_9 : i32
    %15 = arith.extui %14 : i1 to i32
    %c0_i32_10 = arith.constant 0 : i32
    %16 = arith.cmpi ne, %15, %c0_i32_10 : i32
    scf.if %16 {
      %17 = vector.extract_strided_slice %0 {offsets = [0, 0], sizes = [1, 64], strides = [1, 1]} : vector<8x128xf32> to vector<1x64xf32>
      %18 = vector.extract_strided_slice %0 {offsets = [3, 0], sizes = [1, 64], strides = [1, 1]} : vector<8x128xf32> to vector<1x64xf32>
      %19 = vector.extract_strided_slice %0 {offsets = [5, 0], sizes = [1, 1], strides = [1, 1]} : vector<8x128xf32> to vector<1x1xf32>
      %c0_11 = arith.constant 0 : index
      %c0_12 = arith.constant 0 : index
      %20 = vector.load %arg9[%c0_11, %c0_12] : memref<8x64xf32, #tpu.memory_space<vmem>>, vector<8x64xf32>
      %21 = vector.broadcast %17 : vector<1x64xf32> to vector<8x64xf32>
      %22 = arith.addf %20, %21 : vector<8x64xf32>
      %cst_13 = arith.constant 0.000000e+00 : f32
      %23 = vector.broadcast %cst_13 : f32 to vector<8x64xf32>
      %24 = arith.maximumf %22, %23 : vector<8x64xf32>
      %cst_14 = arith.constant dense<0.000000e+00> : vector<1x8xf32>
      %25 = tpu.matmul %18, %24, %cst_14 {dimension_numbers = #tpu.dot_dimension_numbers<[1], [1], [0], [0], [0, 0, 1, 0], [], []>} : vector<1x64xf32>, vector<8x64xf32>, vector<1x8xf32> -> vector<1x8xf32>
      %c0_15 = arith.constant 0 : index
      %c0_16 = arith.constant 0 : index
      %26 = vector.load %arg10[%c0_15, %c0_16] : memref<1x8xf32, #tpu.memory_space<vmem>>, vector<1x8xf32>
      %27 = arith.addf %25, %26 : vector<1x8xf32>
      %28 = vector.broadcast %19 : vector<1x1xf32> to vector<1x8xf32>
      %29 = arith.addf %27, %28 : vector<1x8xf32>
      %30 = vector.shape_cast %29 : vector<1x8xf32> to vector<1x1x8xf32>
      %c0_17 = arith.constant 0 : index
      %c0_18 = arith.constant 0 : index
      %c0_19 = arith.constant 0 : index
      %31 = vector.load %arg8[%c0_17, %c0_18, %c0_19] : memref<1x1x8xf32, #tpu.memory_space<vmem>>, vector<1x1x8xf32>
      tpu.vector_store %arg8[%c0_17, %c0_18, %c0_19], %30 {strides = array<i32>} : memref<1x1x8xf32, #tpu.memory_space<vmem>>, vector<1x1x8xf32>,
    } else {
    }
    return
  }
  func.func @transform_0(%arg0: i32, %arg1: i32) -> (i32, i32) {
    %c0_i32 = arith.constant 0 : i32
    return %arg0, %arg1 : i32, i32
  }
  func.func @transform_1(%arg0: i32, %arg1: i32) -> (i32, i32) {
    %c0_i32 = arith.constant 0 : i32
    %c0_i32_0 = arith.constant 0 : i32
    %c0_i32_1 = arith.constant 0 : i32
    return %c0_i32, %c0_i32_0 : i32, i32
  }
  func.func @transform_2(%arg0: i32, %arg1: i32) -> (i32, i32) {
    %c0_i32 = arith.constant 0 : i32
    %c0_i32_0 = arith.constant 0 : i32
    return %arg0, %c0_i32 : i32, i32
  }
  func.func @transform_3(%arg0: i32, %arg1: i32) -> (i32, i32) {
    %c0_i32 = arith.constant 0 : i32
    %c0_i32_0 = arith.constant 0 : i32
    %c0_i32_1 = arith.constant 0 : i32
    return %c0_i32, %c0_i32_0 : i32, i32
  }
  func.func @transform_4(%arg0: i32, %arg1: i32) -> (i32, i32) {
    %c0_i32 = arith.constant 0 : i32
    %c0_i32_0 = arith.constant 0 : i32
    %c0_i32_1 = arith.constant 0 : i32
    return %c0_i32, %c0_i32_0 : i32, i32
  }
  func.func @transform_5(%arg0: i32, %arg1: i32) -> (i32, i32) {
    %c0_i32 = arith.constant 0 : i32
    %c0_i32_0 = arith.constant 0 : i32
    %c0_i32_1 = arith.constant 0 : i32
    return %c0_i32, %c0_i32_0 : i32, i32
  }
  func.func @transform_6(%arg0: i32, %arg1: i32) -> (i32, i32, i32) {
    %c0_i32 = arith.constant 0 : i32
    %c0_i32_0 = arith.constant 0 : i32
    %c0_i32_1 = arith.constant 0 : i32
    return %arg0, %c0_i32, %c0_i32_0 : i32, i32, i32
  }
}

</mosaic_0001>

<bundles_post_ra>
// kernel: tpu_custom_call.1
= control target key start
LH: loop header
LB: loop body
LE: loop exit
PB: predicated region body
PF: predicated region fallthrough
CT: control target
= control target key end

     0   :  { %11 = vsyncpa [#allocation5], 0  ;;  %s1031_s0 = inlined_call_operand.hbm [shape: f32[8,128], index: 0, kind: input, shape index: {}]   ;;  %s1032_s1 = inlined_call_operand.hbm [shape: bf16[128,64], index: 1, kind: input, shape index: {}]   ;;  %s1033_s2 = inlined_call_operand.hbm [shape: f32[8,16], index: 2, kind: input, shape index: {}]   ;;  %s1034_s3 = inlined_call_operand.hbm [shape: f32[16,32], index: 3, kind: input, shape index: {}]   ;;  %s1035_s4 = inlined_call_operand.hbm [shape: f32[32,16], index: 4, kind: input, shape index: {}]   ;;  %s1036_s5 = inlined_call_operand.hbm [shape: f32[8,128], index: 5, kind: input, shape index: {}]   ;;  %s1037_s6 = inlined_call_operand.hbm [shape: f32[1,1,8], index: 6, kind: output, shape index: {}]  }
   0x1   :  { %12 = vsyncpa [#allocation8], 0 }
   0x2   :  { %13 = vsyncpa [#allocation11], 0 }
   0x3   :  { %14 = vsyncpa [#allocation14], 0 }
   0x4   :  { %15 = vsyncpa [#allocation6], 0  ;;  %s863_s21 = smov [#allocation7]   ;;  %s699_s25 = scalar_lea.hbm %s1032_s1, 1024 }
   0x5   :  { %s31_s22 = sshll.u32 %s863_s21, 4  ;;  %p700_p0 = scmp.ne.s32.totalorder %s1032_s1, %s699_s25  ;;  %s32_s22 = int_to_ptr.vmem [resolvable:$true] %s31_s22 }
   0x6   :  { %p703_p1 = scmp.lt.u32.totalorder %s699_s25, %s1032_s1 }
   0x8   :  { %p705_p2 = pnand %p703_p1, %p700_p0 }
   0xa   :  { %708 = shalt.err (!%p705_p2)
}
   0xb   :  { %s709_s30 = scalar_lea.vmem %s32_s22, 1024  ;;  %p714_p4 = scmp.lt.s32.totalorder %s32_s22, %s32_s22 }
   0xc   :  { %p710_p3 = scmp.ne.s32.totalorder %s32_s22, %s709_s30  ;;  %p715_p5 = scmp.lt.s32.totalorder %s709_s30, %s709_s30 }
   0xe   :  { %p716_p6 = por %p715_p5, %p714_p4 }
  0x10   :  { %p717_p7 = pnand %p716_p6, %p710_p3 }
  0x12   :  { %720 = shalt.err (!%p717_p7)
}
  0x13   :  { %s864_s7 = smov 64   ;;  %s865_s8 = smov 4  }
  0x14   :  { %37 = dma.hbm_to_vmem [thread:$0]  %s1032_s1, 1024, %s32_s22, [#allocation8], %s864_s7, %s864_s7, %s865_s8  }
  0x15   :  { %s866_s11 = smov [#allocation10]   ;;  %s721_s15 = scalar_lea.hbm %s1034_s3, 256 }
  0x16   :  { %s53_s12 = sshll.u32 %s866_s11, 4  ;;  %p722_p8 = scmp.ne.s32.totalorder %s1034_s3, %s721_s15  ;;  %s54_s12 = int_to_ptr.vmem [resolvable:$true] %s53_s12 }
  0x17   :  { %p725_p9 = scmp.lt.u32.totalorder %s721_s15, %s1034_s3 }
  0x19   :  { %p727_p10 = pnand %p725_p9, %p722_p8 }
  0x1b   :  { %730 = shalt.err (!%p727_p10)
}
  0x1c   :  { %s731_s20 = scalar_lea.vmem %s54_s12, 256  ;;  %p736_p12 = scmp.lt.s32.totalorder %s54_s12, %s54_s12 }
  0x1d   :  { %p732_p11 = scmp.ne.s32.totalorder %s54_s12, %s731_s20  ;;  %p737_p13 = scmp.lt.s32.totalorder %s731_s20, %s731_s20 }
  0x1f   :  { %p738_p0 = por %p737_p13, %p736_p12 }
  0x21   :  { %p739_p1 = pnand %p738_p0, %p732_p11 }
  0x23   :  { %742 = shalt.err (!%p739_p1)
}
  0x24   :  { %s867_s1 = smov 128   ;;  %s868_s21 = smov 8  }
  0x25   :  { %59 = dma.hbm_to_vmem [thread:$0]  %s1034_s3, 256, %s54_s12, [#allocation11], %s867_s1, %s867_s1, %s868_s21  }
  0x26   :  { %s869_s24 = smov [#allocation4]   ;;  %s870_s26 = smov [#allocation9]  }
  0x27   :  { %s22_s25 = sshll.u32 %s869_s24, 4  ;;  %s44_s27 = sshll.u32 %s870_s26, 4  ;;  %s23_s25 = int_to_ptr.vmem [resolvable:$true] %s22_s25  ;;  %s45_s27 = int_to_ptr.vmem [resolvable:$true] %s44_s27 }
  0x28   :  { %s743_s30 = scalar_lea.hbm %s1031_s0, 128 }
  0x29   :  { %p744_p2 = scmp.ne.s32.totalorder %s1031_s0, %s743_s30  ;;  %p747_p3 = scmp.lt.u32.totalorder %s743_s30, %s1031_s0 }
  0x2b   :  { %p749_p4 = pnand %p747_p3, %p744_p2 }
  0x2d   :  { %752 = shalt.err (!%p749_p4)
}
  0x2e   :  { %s753_s3 = scalar_lea.vmem %s23_s25, 128  ;;  %p758_p6 = scmp.lt.s32.totalorder %s23_s25, %s23_s25 }
  0x2f   :  { %p754_p5 = scmp.ne.s32.totalorder %s23_s25, %s753_s3  ;;  %p759_p7 = scmp.lt.s32.totalorder %s753_s3, %s753_s3 }
  0x31   :  { %p760_p8 = por %p759_p7, %p758_p6 }
  0x33   :  { %p761_p9 = pnand %p760_p8, %p754_p5 }
  0x35   :  { %764 = shalt.err (!%p761_p9)
}
  0x36   :  { %25 = dma.hbm_to_vmem [thread:$0]  %s1031_s0, 128, %s23_s25, [#allocation5]  }
  0x37   :  { %s765_s15 = scalar_lea.hbm %s1033_s2, 128 }
  0x38   :  { %p766_p10 = scmp.ne.s32.totalorder %s1033_s2, %s765_s15  ;;  %p769_p11 = scmp.lt.u32.totalorder %s765_s15, %s1033_s2 }
  0x3a   :  { %p771_p12 = pnand %p769_p11, %p766_p10 }
  0x3c   :  { %774 = shalt.err (!%p771_p12)
}
  0x3d   :  { %s775_s20 = scalar_lea.vmem %s45_s27, 128  ;;  %p780_p0 = scmp.lt.s32.totalorder %s45_s27, %s45_s27 }
  0x3e   :  { %p776_p13 = scmp.ne.s32.totalorder %s45_s27, %s775_s20  ;;  %p781_p1 = scmp.lt.s32.totalorder %s775_s20, %s775_s20 }
  0x40   :  { %p782_p2 = por %p781_p1, %p780_p0 }
  0x42   :  { %p783_p3 = pnand %p782_p2, %p776_p13 }
  0x44   :  { %786 = shalt.err (!%p783_p3)
}
  0x45   :  { %47 = dma.hbm_to_vmem [thread:$0]  %s1033_s2, 128, %s45_s27, [#allocation8]  }
  0x46   :  { %s871_s23 = smov [#allocation12]   ;;  %s872_s25 = smov [#allocation13]  }
  0x47   :  { %s65_s24 = sshll.u32 %s871_s23, 4  ;;  %s78_s26 = sshll.u32 %s872_s25, 4  ;;  %s66_s24 = int_to_ptr.vmem [resolvable:$true] %s65_s24  ;;  %s79_s26 = int_to_ptr.vmem [resolvable:$true] %s78_s26 }
  0x48   :  { %s787_s30 = scalar_lea.hbm %s1035_s4, 512 }
  0x49   :  { %p788_p4 = scmp.ne.s32.totalorder %s1035_s4, %s787_s30  ;;  %p791_p5 = scmp.lt.u32.totalorder %s787_s30, %s1035_s4 }
  0x4b   :  { %p793_p6 = pnand %p791_p5, %p788_p4 }
  0x4d   :  { %796 = shalt.err (!%p793_p6)
}
  0x4e   :  { %s797_s2 = scalar_lea.vmem %s66_s24, 512  ;;  %p802_p8 = scmp.lt.s32.totalorder %s66_s24, %s66_s24 }
  0x4f   :  { %p798_p7 = scmp.ne.s32.totalorder %s66_s24, %s797_s2  ;;  %p803_p9 = scmp.lt.s32.totalorder %s797_s2, %s797_s2 }
  0x51   :  { %p804_p10 = por %p803_p9, %p802_p8 }
  0x53   :  { %p805_p11 = pnand %p804_p10, %p798_p7 }
  0x55   :  { %808 = shalt.err (!%p805_p11)
}
  0x56   :  { %71 = dma.hbm_to_vmem [thread:$0]  %s1035_s4, 512, %s66_s24, [#allocation11], %s867_s1, %s867_s1, %s868_s21  }
  0x57   :  { %s809_s13 = scalar_lea.hbm %s1036_s5, 128 }
  0x58   :  { %p810_p12 = scmp.ne.s32.totalorder %s1036_s5, %s809_s13  ;;  %p813_p13 = scmp.lt.u32.totalorder %s809_s13, %s1036_s5 }
  0x5a   :  { %p815_p0 = pnand %p813_p13, %p810_p12 }
  0x5c   :  { %818 = shalt.err (!%p815_p0)
}
  0x5d   :  { %s819_s18 = scalar_lea.vmem %s79_s26, 128  ;;  %p824_p2 = scmp.lt.s32.totalorder %s79_s26, %s79_s26 }
  0x5e   :  { %p820_p1 = scmp.ne.s32.totalorder %s79_s26, %s819_s18  ;;  %p825_p3 = scmp.lt.s32.totalorder %s819_s18, %s819_s18 }
  0x60   :  { %p826_p4 = por %p825_p3, %p824_p2 }
  0x62   :  { %p827_p5 = pnand %p826_p4, %p820_p1 }
  0x64   :  { %830 = shalt.err (!%p827_p5)
}
  0x65   :  { %81 = dma.hbm_to_vmem [thread:$0]  %s1036_s5, 128, %s79_s26, [#allocation14]  }
  0x66   :  { %853 = dma.done.wait [#allocation5], 128  }
  0x67   :  { %854 = vsyncadd [#allocation5], 4294967168 }
  0x68   :  { %855 = dma.done.wait [#allocation8], 1152  }
  0x69   :  { %856 = vsyncadd [#allocation8], 4294966144 }
  0x6a   :  { %857 = dma.done.wait [#allocation11], 768  }
  0x6b   :  { %858 = vsyncadd [#allocation11], 4294966528 }
  0x6c   :  { %859 = dma.done.wait [#allocation14], 128  }
  0x6d   :  { %860 = vsyncadd [#allocation14], 4294967168  ;;  %v873_v0 = vmov 0.0|0.0   ;;  %vm874_vm0 = vmmov 0   ;;  %v875_v1 = vmov 0.0   ;;  %v109_v2 = vld [vmem:[#allocation10] sm:$0xff]  ;;  %v111_v22 = vlaneseq }
  0x6e   :  { %666 = vmatprep.subr.bf16.mxu1 %v873_v0  ;;  %622 = vmatprep.mubr.msk.f32.mxu1 %vm874_vm0, %v875_v1  ;;  %v110_v3 = vld [vmem:[#allocation10 + $0x8] sm:$0xff]  ;;  %v691_v5 = vld [vmem:[#allocation7] sm:$0xff]   ;;  %vm115_vm1 = vcmask 130048   ;;  %v692_v7 = vld [vmem:[#allocation7 + $0x8] sm:$0xff]   ;;  %vm106_vm2 = vcmask 523264   ;;  %vm198_vm3 = vcmask 261120  }
  0x6f   :  { %641 = vmatprep.subr.bf16.mxu0 %v875_v1  ;;  %657 = vmatprep.mubr.msk.bf16.mxu0 %vm874_vm0, %v875_v1  ;;  %v667_v4 = vpack.c.bf16 %v110_v3, %v109_v2  ;;  %v108_v6 = vld [vmem:[#allocation9] sm:$0xff]  ;;  %v693_v8 = vld [vmem:[#allocation7 + $0x10] sm:$0xff]   ;;  %v190_v9 = vld [vmem:[#allocation12] sm:$0xff]  ;;  %107 = vst.msk [vmem:[#allocation2] sm:$0xff] %vm106_vm2, %v875_v1  ;;  %v112_v23 = vshrl.u32 %v111_v22, 7  ;;  %v876_v37 = vmov 0  }
  0x70   :  { %642 = vmatpush3.bf16.msra.mxu0 %v691_v5  ;;  %v191_v10 = vld [vmem:[#allocation12 + $0x8] sm:$0xff]  ;;  %v694_v12 = vld [vmem:[#allocation7 + $0x18] sm:$0xff]   ;;  %v696_v14 = vld [vmem:[#allocation7 + $0x28] sm:$0xff]   ;;  %690 = vset.pattern.permute.xlu0 %v876_v37  ;;  %vm350_vm4 = vcmask 57344   ;;  %s877_s5 = smov [#allocation15]  }
  0x71   :  { %668 = vmatpush3.bf16.msra.mxu1 %v667_v4  ;;  %643 = vmatprep.subr.bf16.mxu0 %v875_v1  ;;  %v670_v11 = vpack.c.bf16 %v191_v10, %v190_v9  ;;  %v695_v13 = vld [vmem:[#allocation7 + $0x20] sm:$0xff]   ;;  %v697_v15 = vld [vmem:[#allocation7 + $0x30] sm:$0xff]   ;;  %v698_v16 = vld [vmem:[#allocation7 + $0x38] sm:$0xff]   ;;  %v113_v24 = vsub.s32 1, %v112_v23  ;;  %v473_v38 = vsub.s32 0, %v112_v23  ;;  %v196_v39 = vsub.s32 2, %v112_v23 }
  0x72   :  { %669 = vmatprep.subr.bf16.mxu1 %v873_v0  ;;  %v352_v17 = vld [vmem:[#allocation4] sm:$0xff]  ;;  %v192_v19 = vld [vmem:[#allocation12 + $0x10] sm:$0xff]  ;;  %v193_v20 = vld [vmem:[#allocation12 + $0x18] sm:$0xff]  ;;  %s569_s21 = sshll.u32 %s877_s5, 4  ;;  %s570_s21 = int_to_ptr.vmem [resolvable:$true] %s569_s21 }
  0x73   :  { %v353_v18 = vpack.c.bf16 %v352_v17, %v352_v17  ;;  %v673_v21 = vpack.c.bf16 %v193_v20, %v192_v19  ;;  %v101_v25 = vld [vmem:[#allocation13] sm:$0xff]  ;;  %s831_s19 = scalar_lea.vmem %s570_s21, 16  ;;  %s835_s20 = scalar_lea.vmem %s570_s21, 32 }
  0x74   :  { %623 = vmatmul.mubr.msk.f32.vlgmr.msra.gmra.mrb[0].mxu1 %vm115_vm1, %v108_v6  ;;  %644 = vmatpush3.bf16.msra.mxu0 %v692_v7  ;;  %v114_v26 = vrot.slane %v101_v25, %v113_v24  ;;  %v197_v40 = vrot.slane %v101_v25, %v196_v39  ;;  %v474_v41 = vrot.slane %v101_v25, %v473_v38  ;;  %v274_v48 = vrot.slane %v101_v25, 4  ;;  %p832_p6 = scmp.ne.s32.totalorder %s570_s21, %s831_s19  ;;  %p836_p7 = scmp.lt.s32.totalorder %s570_s21, %s570_s21 }
  0x75   :  { %633 = vmatprep.mubr.msk.f32.mxu1 %vm874_vm0, %v875_v1  ;;  %645 = vmatprep.subr.bf16.mxu0 %v875_v1  ;;  %v479_v50 = vrot.slane %v101_v25, 3  ;;  %p837_p8 = scmp.lt.s32.totalorder %s835_s20, %s831_s19 }
  0x76   :  { %671 = vmatpush3.bf16.msra.mxu1 %v670_v11  ;;  %v375_v31 = vld [vmem:[#allocation2] sm:$0xff]  ;;  %556 = vperm.xlu0 %690, %v101_v25  }
  0x77   :  { %672 = vmatprep.subr.bf16.mxu1 %v873_v0  ;;  %p838_p9 = por %p837_p8, %p836_p7 }
  0x78   :  { %646 = vmatpush3.bf16.msra.mxu0 %v693_v8 }
  0x79   :  { %647 = vmatprep.subr.bf16.mxu0 %v875_v1  ;;  %p839_p10 = pnand %p838_p9, %p832_p6 }
  0x7a   :  { %674 = vmatpush3.bf16.msra.mxu1 %v673_v21 }
  0x7b   :  { %636 = vmatprep.subr.mxu1 %v875_v1 }
  0x7c   :  { %648 = vmatpush3.bf16.msra.mxu0 %v694_v12 }
  0x7d   :  { %649 = vmatprep.subr.bf16.mxu0 %v875_v1 }
  0x80   :  { %650 = vmatpush3.bf16.msra.mxu0 %v695_v13 }
  0x81   :  { %651 = vmatprep.subr.bf16.mxu0 %v875_v1 }
  0x84   :  { %652 = vmatpush3.bf16.msra.mxu0 %v696_v14 }
  0x85   :  { %653 = vmatprep.subr.bf16.mxu0 %v875_v1 }
  0x88   :  { %654 = vmatpush3.bf16.msra.mxu0 %v697_v15 }
  0x89   :  { %655 = vmatprep.subr.bf16.mxu0 %v875_v1 }
  0x8c   :  { %656 = vmatpush3.bf16.msra.mxu0 %v698_v16 }
  0x8f   :  { %658 = vmatmul.mubr.bf16.vlgmr.msra.gmra.mrb[0].mxu0 %v353_v18 }
  0xf5   :  { %v557_v54 = vpop.permute.xlu0 %556 }
  0xf6   :  { %v558_v56 = vrot.slane %v557_v54, 5 }
 0x147   :  { %v185_v27 = vpop.f32.mrb[0].mxu1 }
 0x148   :  { %v186_v28 = vadd.f32 %v185_v27, %v114_v26  ;;  %v624_v29 = vpop.f32.mrb[1].mxu1 }
 0x14a   :  { %v189_v30 = vmax.f32 %v186_v28, 0.0 }
 0x14c   :  { %634 = vmatmul.mubr.msk.f32.vlgmr.msra.gmra.mrb[2].mxu1 %vm198_vm3, %v189_v30 }
 0x14d   :  { %638 = vmatprep.mubr.msk.f32.mxu1 %vm874_vm0, %v875_v1 }
 0x162   :  { %v458_v32 = vpop.f32.mrb[0].mxu0 }
 0x163   :  { %v464_v33 = vadd.f32 %v458_v32, %v375_v31  ;;  %v659_v34 = vpop.f32.mrb[1].mxu0 }
 0x164   :  { %v461_v35 = vpop.f32.mrb[2].mxu0 }
 0x165   :  { %466 = vst.msk [vmem:[#allocation2] sm:$0xff] %vm106_vm2, %v464_v33  ;;  %v660_v36 = vpop.f32.mrb[3].mxu0 }
 0x16c   :  { %v470_v42 = vld [vmem:[#allocation2] sm:$0xff] }
 0x16d   :  { %v475_v46 = vadd.f32 %v474_v41, %v470_v42 }
 0x16f   :  { %v476_v49 = vmax.f32 %v475_v46, 0.0 }
 0x21f   :  { %v268_v43 = vpop.f32.mrb[2].mxu1 }
 0x220   :  { %v269_v44 = vadd.f32 %v268_v43, %v197_v40  ;;  %v635_v45 = vpop.f32.mrb[3].mxu1 }
 0x222   :  { %v272_v47 = vmax.f32 %v269_v44, 0.0 }
 0x224   :  { %637 = vmatpush3.xpose.msk.msra.mxu1 %vm115_vm1, %v272_v47 }
 0x225   :  { %661 = vmatprep.subr.mxu1 %v875_v1 }
 0x227   :  { %639 = vmatmul.mubr.msk.f32.vlgmr.msra.gmra.mrb[4].mxu1 %vm115_vm1, %v274_v48 }
 0x228   :  { %662 = vmatpush3.xpose.msk.msra.mxu1 %vm106_vm2, %v476_v49  ;;  %663 = vmatprep.mubr.msk.f32.mxu1 %vm874_vm0, %v875_v1 }
 0x22b   :  { %664 = vmatmul.mubr.msk.f32.vlgmr.msra.gmra.mrb[6].mxu1 %vm106_vm2, %v479_v50 }
 0x2fa   :  { %v346_v51 = vpop.f32.mrb[4].mxu1 }
 0x2fb   :  { %351 = vst.msk [vmem:[#allocation3] sm:$0x1] %vm350_vm4, %v346_v51  ;;  %v640_v52 = vpop.f32.mrb[5].mxu1 }
 0x2fe   :  { %v551_v53 = vpop.f32.mrb[6].mxu1 }
 0x2ff   :  { %v665_v55 = vpop.f32.mrb[7].mxu1 }
 0x302   :  { %v477_v57 = vld [vmem:[#allocation3] sm:$0x1] }
 0x303   :  { %v552_v58 = vadd.f32 %v551_v53, %v477_v57 }
 0x305   :  { %v560_v59 = vadd.f32 %v558_v56, %v552_v58 }
 0x307   :  { %562 = vst.msk [vmem:[#allocation15] sm:$0x1] %vm350_vm4, %v560_v59 }
 0x308   :  { %842 = shalt.err (!%p839_p10)
}
 0x309   :  { %s843_s23 = scalar_lea.hbm %s1037_s6, 16 }
 0x30a   :  { %p844_p11 = scmp.ne.s32.totalorder %s1037_s6, %s843_s23  ;;  %p847_p12 = scmp.lt.u32.totalorder %s843_s23, %s1037_s6 }
 0x30c   :  { %p849_p13 = pnand %p847_p12, %p844_p11 }
 0x30e   :  { %852 = shalt.err (!%p849_p13)
}
 0x30f   :  { %572 = dma.vmem_to_hbm [thread:$0]  %s570_s21, 16, %s1037_s6, [#allocation6]  }
 0x310   :  { %861 = dma.done.wait [#allocation6], 16  }
 0x311   :  { %862 = vsyncadd [#allocation6], 4294967280 }
 0x312   :  { %576 = vsyncpa [#allocation5], 1 }
 0x313   :  { %577 = vsyncpa [#allocation8], 1 }
 0x314   :  { %578 = vsyncpa [#allocation11], 1 }
 0x315   :  { %579 = vsyncpa [#allocation14], 1 }
 0x316   :  { %580 = vsyncpa [#allocation6], 1 }

</bundles_post_ra>
